<compile_context>
chip_gen: v7x
topology: tpu7x:2x2x1
jax: 0.10.0
libtpu: 0.0.40
codegen_flags: <defaults>
</compile_context>

<pallas_src>
import functools

import jax
import jax.numpy as jnp
from jax.experimental import pallas as pl
from jax.experimental.pallas import tpu as pltpu


def _energy_loss_kernel(x_ref, tgt_ref, out_ref, *, hw, num_ch):
    """One grid step: a (C, tile_p) slab of one batch element's pixels."""
    i = pl.program_id(1)
    tile_p = x_ref.shape[1]

    @pl.when(i == 0)
    def _():
        out_ref[...] = jnp.zeros_like(out_ref)

    x = x_ref[...].astype(jnp.float32)   # (C, tile_p)
    tgt = tgt_ref[...]                   # (1, tile_p) int32 class indices

    # --- Softmax2d: softmax over the channel (sublane) axis ---
    m1 = jnp.max(x, axis=0, keepdims=True)
    e1 = jnp.exp(x - m1)
    p = e1 / jnp.sum(e1, axis=0, keepdims=True)              # (C, tile_p), in (0, 1]

    # --- CrossEntropyLoss on the probabilities ---
    # per-pixel loss = logsumexp_c(p) - p[target]; p <= 1, so the second
    # logsumexp needs no max subtraction.
    lse2 = jnp.log(jnp.sum(jnp.exp(p), axis=0, keepdims=True))        # (1, tile_p)
    ch = jax.lax.broadcasted_iota(jnp.int32, (num_ch, tile_p), 0)
    p_t = jnp.sum(jnp.where(ch == tgt, p, 0.0), axis=0, keepdims=True)  # (1, tile_p)

    # Mask lanes that are padding beyond the real H*W pixels.
    col = i * tile_p + jax.lax.broadcasted_iota(jnp.int32, (1, tile_p), 1)
    valid = (col < hw).astype(jnp.float32)

    # Per-lane partial sums accumulated in the VMEM-resident output block;
    # the cross-lane reduction is deferred to the wrapper.
    out_ref[...] += valid * (lse2 - p_t)


@functools.partial(jax.jit, static_argnames=("tile_p",))
def energy_loss(logits, target, *, tile_p=2048):
    """logits: (N, C, H, W) float, target: (N, H, W) int class indices."""
    N, C, H, W = logits.shape
    HW = H * W
    P = N * HW

    # Free, contiguous reshape -- no HBM transpose: channels are already the
    # second-to-last axis of (N, C, HW).
    x = logits.reshape(N, C, HW)
    tgt = target.reshape(N, 1, HW).astype(jnp.int32)

    # Pixel-tile width: big tiles amortize per-step overhead; clamp to the
    # 128-aligned pixel count for small inputs so we never over-pad.
    hw_128 = ((HW + 127) // 128) * 128
    tile = min(tile_p, hw_128)
    hw_pad = ((HW + tile - 1) // tile) * tile
    if hw_pad != HW:
        x = jnp.pad(x, ((0, 0), (0, 0), (0, hw_pad - HW)))
        tgt = jnp.pad(tgt, ((0, 0), (0, 0), (0, hw_pad - HW)))

    grid = (N, hw_pad // tile)

    # VMEM per step (double-buffered): ~2*C*tile*4 B logits + 2*tile*4 B
    # targets -- tiny even on v7x's 64 MiB VMEM unless C is very large (then
    # lower tile_p or raise vmem_limit_bytes).  Note: f32 sublane depth is 8,
    # so C < 8 leaves part of each vreg as padding; C a multiple of 8 (16 for
    # bf16) uses the VPU fully.  For v5e, casting logits to bf16 before the
    # call would further halve HBM traffic (compute stays f32 in-kernel).
    kernel = functools.partial(_energy_loss_kernel, hw=HW, num_ch=C)

    partial_sums = pl.pallas_call(
        kernel,
        out_shape=jax.ShapeDtypeStruct((N, 1, tile), jnp.float32),
        grid_spec=pltpu.PrefetchScalarGridSpec(
            num_scalar_prefetch=0,
            grid=grid,
            in_specs=[
                pl.BlockSpec((None, C, tile), lambda n, i: (n, 0, i)),
                pl.BlockSpec((None, 1, tile), lambda n, i: (n, 0, i)),
            ],
            # One (1, tile) per-lane accumulator per batch element: revisited
            # across the pixel-tile axis ("arbitrary"), distinct per n
            # ("parallel" is safe and lets v7x use both TensorCores).
            out_specs=pl.BlockSpec((None, 1, tile), lambda n, i: (n, 0, 0)),
        ),
        compiler_params=pltpu.CompilerParams(
            dimension_semantics=("parallel", "arbitrary"),
        ),
    )(x, tgt)

    # CrossEntropyLoss default reduction='mean' over all N*H*W pixels.
    return jnp.sum(partial_sums) / jnp.float32(P)


def _reference(logits, target):
    p = jax.nn.softmax(logits, axis=1)
    logq = jax.nn.log_softmax(p, axis=1)
    oh = jax.nn.one_hot(target, logits.shape[1], dtype=jnp.float32)   # (N, H, W, C)
    oh = jnp.transpose(oh, (0, 3, 1, 2))                              # (N, C, H, W)
    return -jnp.mean(jnp.sum(oh * logq, axis=1))


if __name__ == "__main__":
    key = jax.random.PRNGKey(0)
    k1, k2 = jax.random.split(key)

    N, C, H, W = 2, 4, 16, 16
    logits = jax.random.normal(k1, (N, C, H, W), dtype=jnp.float32)
    target = jax.random.randint(k2, (N, H, W), 0, C, dtype=jnp.int32)

    loss = energy_loss(logits, target)
    loss = jax.block_until_ready(loss)

    ref = _reference(logits, target)
    assert jnp.allclose(loss, ref, atol=1e-5, rtol=1e-5), (loss, ref)

    print("KERNEL_OK")
</pallas_src>

<mosaic_0001>
module attributes {stable_mosaic.version = 11 : i64} {
  func.func @_energy_loss_kernel(%arg0: i32, %arg1: i32, %arg2: memref<1x4x256xf32, #tpu.memory_space<vmem>>, %arg3: memref<1x1x256xi32, #tpu.memory_space<vmem>>, %arg4: memref<1x1x256xf32, #tpu.memory_space<vmem>>) attributes {dimension_semantics = [#tpu.dimension_semantics<parallel>, #tpu.dimension_semantics<arbitrary>], iteration_bounds = array<i64: 2, 1>, scalar_prefetch = 0 : i64, scratch_operands = 0 : i64, tpu.core_type = #tpu.core_type<tc>, window_params = [{transform_indices = @transform_0, window_bounds = array<i64: 1, 4, 256>}, {transform_indices = @transform_1, window_bounds = array<i64: 1, 1, 256>}, {transform_indices = @transform_2, window_bounds = array<i64: 1, 1, 256>}]} {
    %c0_i32 = arith.constant 0 : i32
    %0 = arith.cmpi eq, %arg1, %c0_i32 : i32
    %1 = arith.extui %0 : i1 to i32
    %c0_i32_0 = arith.constant 0 : i32
    %2 = arith.cmpi ne, %1, %c0_i32_0 : i32
    scf.if %2 {
      %cst_17 = arith.constant 0.000000e+00 : f32
      %43 = vector.broadcast %cst_17 : f32 to vector<1x256xf32>
      %c0_18 = arith.constant 0 : index
      %c0_19 = arith.constant 0 : index
      %c0_20 = arith.constant 0 : index
      %44 = vector.load %arg4[%c0_18, %c0_19, %c0_20] : memref<1x1x256xf32, #tpu.memory_space<vmem>>, vector<1x1x256xf32>
      %45 = vector.shape_cast %44 : vector<1x1x256xf32> to vector<1x256xf32>
      %46 = vector.shape_cast %43 : vector<1x256xf32> to vector<1x1x256xf32>
      tpu.vector_store %arg4[%c0_18, %c0_19, %c0_20], %46 {strides = array<i32>} : memref<1x1x256xf32, #tpu.memory_space<vmem>>, vector<1x1x256xf32>,
    } else {
    }
    %c0 = arith.constant 0 : index
    %c0_1 = arith.constant 0 : index
    %c0_2 = arith.constant 0 : index
    %3 = vector.load %arg2[%c0, %c0_1, %c0_2] : memref<1x4x256xf32, #tpu.memory_space<vmem>>, vector<1x4x256xf32>
    %4 = vector.shape_cast %3 : vector<1x4x256xf32> to vector<4x256xf32>
    %c0_3 = arith.constant 0 : index
    %c0_4 = arith.constant 0 : index
    %c0_5 = arith.constant 0 : index
    %5 = vector.load %arg3[%c0_3, %c0_4, %c0_5] : memref<1x1x256xi32, #tpu.memory_space<vmem>>, vector<1x1x256xi32>
    %6 = vector.shape_cast %5 : vector<1x1x256xi32> to vector<1x256xi32>
    %cst = arith.constant dense<0xFF800000> : vector<256xf32>
    %7 = vector.multi_reduction <maximumf>, %4, %cst [0] : vector<4x256xf32> to vector<256xf32>
    %8 = vector.shape_cast %7 : vector<256xf32> to vector<1x256xf32>
    %9 = vector.broadcast %8 : vector<1x256xf32> to vector<4x256xf32>
    %10 = arith.subf %4, %9 : vector<4x256xf32>
    %11 = math.exp %10 : vector<4x256xf32>
    %cst_6 = arith.constant dense<0.000000e+00> : vector<256xf32>
    %12 = vector.multi_reduction <add>, %11, %cst_6 [0] : vector<4x256xf32> to vector<256xf32>
    %13 = vector.shape_cast %12 : vector<256xf32> to vector<1x256xf32>
    %14 = vector.broadcast %13 : vector<1x256xf32> to vector<4x256xf32>
    %15 = arith.divf %11, %14 : vector<4x256xf32>
    %16 = math.exp %15 : vector<4x256xf32>
    %cst_7 = arith.constant dense<0.000000e+00> : vector<256xf32>
    %17 = vector.multi_reduction <add>, %16, %cst_7 [0] : vector<4x256xf32> to vector<256xf32>
    %18 = vector.shape_cast %17 : vector<256xf32> to vector<1x256xf32>
    %19 = math.log %18 : vector<1x256xf32>
    %20 = tpu.iota {dimensions = array<i32: 0>} : vector<4x256xi32>
    %21 = vector.broadcast %6 : vector<1x256xi32> to vector<4x256xi32>
    %22 = arith.cmpi eq, %20, %21 : vector<4x256xi32>
    %cst_8 = arith.constant 0.000000e+00 : f32
    %23 = vector.broadcast %cst_8 : f32 to vector<4x256xf32>
    %24 = arith.select %22, %15, %23 : vector<4x256xi1>, vector<4x256xf32>
    %cst_9 = arith.constant dense<0.000000e+00> : vector<256xf32>
    %25 = vector.multi_reduction <add>, %24, %cst_9 [0] : vector<4x256xf32> to vector<256xf32>
    %26 = vector.shape_cast %25 : vector<256xf32> to vector<1x256xf32>
    %c256_i32 = arith.constant 256 : i32
    %27 = arith.muli %arg1, %c256_i32 : i32
    %28 = tpu.iota {dimensions = array<i32: 1>} : vector<1x256xi32>
    %29 = vector.broadcast %27 : i32 to vector<1x256xi32>
    %30 = arith.addi %29, %28 : vector<1x256xi32>
    %c256_i32_10 = arith.constant 256 : i32
    %31 = vector.broadcast %c256_i32_10 : i32 to vector<1x256xi32>
    %32 = arith.cmpi slt, %30, %31 : vector<1x256xi32>
    %33 = arith.extui %32 : vector<1x256xi1> to vector<1x256xi32>
    %34 = arith.sitofp %33 : vector<1x256xi32> to vector<1x256xf32>
    %c0_11 = arith.constant 0 : index
    %c0_12 = arith.constant 0 : index
    %c0_13 = arith.constant 0 : index
    %35 = vector.load %arg4[%c0_11, %c0_12, %c0_13] : memref<1x1x256xf32, #tpu.memory_space<vmem>>, vector<1x1x256xf32>
    %36 = vector.shape_cast %35 : vector<1x1x256xf32> to vector<1x256xf32>
    %37 = arith.subf %19, %26 : vector<1x256xf32>
    %38 = arith.mulf %34, %37 : vector<1x256xf32>
    %39 = arith.addf %36, %38 : vector<1x256xf32>
    %c0_14 = arith.constant 0 : index
    %c0_15 = arith.constant 0 : index
    %c0_16 = arith.constant 0 : index
    %40 = vector.load %arg4[%c0_14, %c0_15, %c0_16] : memref<1x1x256xf32, #tpu.memory_space<vmem>>, vector<1x1x256xf32>
    %41 = vector.shape_cast %40 : vector<1x1x256xf32> to vector<1x256xf32>
    %42 = vector.shape_cast %39 : vector<1x256xf32> to vector<1x1x256xf32>
    tpu.vector_store %arg4[%c0_14, %c0_15, %c0_16], %42 {strides = array<i32>} : memref<1x1x256xf32, #tpu.memory_space<vmem>>, vector<1x1x256xf32>,
    return
  }
  func.func @transform_0(%arg0: i32, %arg1: i32) -> (i32, i32, i32) {
    %c0_i32 = arith.constant 0 : i32
    %c0_i32_0 = arith.constant 0 : i32
    return %arg0, %c0_i32, %arg1 : i32, i32, i32
  }
  func.func @transform_1(%arg0: i32, %arg1: i32) -> (i32, i32, i32) {
    %c0_i32 = arith.constant 0 : i32
    %c0_i32_0 = arith.constant 0 : i32
    return %arg0, %c0_i32, %arg1 : i32, i32, i32
  }
  func.func @transform_2(%arg0: i32, %arg1: i32) -> (i32, i32, i32) {
    %c0_i32 = arith.constant 0 : i32
    %c0_i32_0 = arith.constant 0 : i32
    %c0_i32_1 = arith.constant 0 : i32
    return %arg0, %c0_i32, %c0_i32_0 : i32, i32, i32
  }
}

</mosaic_0001>

<bundles_post_ra>
// kernel: energy_loss.1
= control target key start
LH: loop header
LB: loop body
LE: loop exit
PB: predicated region body
PF: predicated region fallthrough
CT: control target
= control target key end

     0   :  { %s530_s9 = smov 0   ;;  %s532_s10 = smov 0   ;;  %s598_s0 = inlined_call_operand.vmem [shape: f32[2,4,256], index: 0, kind: input, shape index: {}]   ;;  %s599_s1 = inlined_call_operand.vmem [shape: s32[2,1,256], index: 1, kind: input, shape index: {}]   ;;  %s600_s2 = inlined_call_operand.vmem [shape: f32[2,1,256], index: 2, kind: output, shape index: {}]  }
   0x1   :  { %s534_s11 = smov 0  }
   0x2 LB: > { %s24_s12 = sadd.s32 1, %s507_s10  ;;  %p444_p0 = scmp.ge.s32.totalorder %s511_s11, 1  ;;  %s511_s11 = sphi %s534_s11, %s12_s11   ;;  %s507_s10 = sphi %s532_s10, %s604_s10   ;;  %s503_s9 = sphi %s530_s9, %s603_s9  }
   0x3   : > { %p26_p1 = scmp.ge.s32.totalorder %s24_s12, 2  ;;  %p147_p2 = scmp.lt.s32.totalorder %s511_s11, 3 }
   0x5   : > { %s606_s12 = smov (%p26_p1, %s24_s12), 0  ;;  %p148_p3 = pnand %p444_p0, %p147_p2 }
   0x6   : > { %p181_p4 = scmp.lt.s32.totalorder (!%p148_p3), %s503_s9, 1  ;;  %v207_v0 = vlaneseq (!%p148_p3)  ;;  %vm217_vm1 = vcmask (!%p148_p3), 1043456   ;;  %v513_v7 = vmov (!%p148_p3), 0.0  }
   0x7   : > { %151 = sbr.rel (%p148_p3) target bundleno = 132 (0x84), region = 28 }
   0x8   : > { %v548_v1 = vshrl.u32 (!%p148_p3), %v207_v0, 7  ;;  %vm550_vm0 = vcmp.lt.s32.totalorder (!%p148_p3), %v207_v0, 256 }
   0xa   : > { %v289_v3 = vsub.s32 (!%p148_p3), 0, %v548_v1  ;;  %v293_v4 = vsub.s32 (!%p148_p3), 1, %v548_v1 }
   0xe   : > { %s608_s9 = smov (!%p181_p4, %s503_s9), 1 }
   0xf   : > { %s451_s13 = sshll.u32 %s608_s9, 3  ;;  %s447_s14 = sshll.u32 %s608_s9, 1 }
  0x10   : > { %s188_s17 = scalar_lea.vmem %s598_s0, %s451_s13  ;;  %s197_s20 = scalar_lea.vmem %s599_s1, %s447_s14 }
  0x11   : > { %s565_s23 = scalar_lea.vmem %s600_s2, %s447_s14  ;;  %v212_v5 = vld [vmem:[%s188_s17] sm:$0xff] }
  0x12   : > { %v213_v6 = vld [vmem:[%s197_s20] sm:$0x3]  ;;  %211 = vst.msk [vmem:[%s565_s23] sm:$0x3] %vm550_vm0, %v513_v7  ;;  %v215_v8 = vcombine.high %v212_v5, %v212_v5  ;;  %v218_v9 = vsel %vm217_vm1, %v212_v5, -inf }
  0x13   : > { %v290_v10 = vrot.slane %v213_v6, %v289_v3  ;;  %v294_v11 = vrot.slane %v213_v6, %v293_v4  ;;  %v219_v12 = vrot.slane %v218_v9, 4 }
  0x14   : > { %v225_v13 = vsel %vm217_vm1, %v215_v8, -inf }
  0x15   : > { %vm295_vm2 = vcmp.eq.s32.totalorder %v548_v1, %v290_v10  ;;  %vm296_vm3 = vcmp.eq.s32.totalorder %v548_v1, %v294_v11  ;;  %v220_v14 = vmax.f32 %v218_v9, %v219_v12  ;;  %v226_v15 = vrot.slane %v225_v13, 4 }
  0x17   : > { %v221_v16 = vrot.slane %v220_v14, 2  ;;  %v227_v17 = vmax.f32 %v225_v13, %v226_v15 }
  0x19   : > { %v222_v18 = vmax.f32 %v220_v14, %v221_v16  ;;  %v228_v19 = vrot.slane %v227_v17, 2 }
  0x1b   : > { %v223_v20 = vrot.slane %v222_v18, 1  ;;  %v229_v21 = vmax.f32 %v227_v17, %v228_v19  ;;  %v514_v17 = vmov 1966171168  }
  0x1d   : > { %v224_v22 = vmax.f32 %v222_v18, %v223_v20  ;;  %v230_v23 = vrot.slane %v229_v21, 1  ;;  %v338_v18 = vunpack.c.l.s4 %v514_v17 }
  0x1f   : > { %v231_v24 = vmax.f32 %v229_v21, %v230_v23  ;;  %v339_v23 = vunpack.c.0.s8 %v338_v18 }
  0x21   : > { %v234_v25 = vcombine.low %v224_v22, %v231_v24 }
  0x23   : > { %v236_v26 = vsub.f32 %v212_v5, %v234_v25 }
  0x25   : > { %v237_v27 = vmul.f32 1.442695, %v236_v26 }
  0x27   : > { %479 = vpow2.f32 %v237_v27 }
  0x31   : > { %v480_v28 = vpop.eup %479 }
  0x32   : > { %v240_v29 = vcombine.high %v480_v28, %v480_v28  ;;  %v242_v30 = vsel %vm217_vm1, %v480_v28, 0.0 }
  0x33   : > { %v243_v31 = vrot.slane %v242_v30, 4 }
  0x34   : > { %v249_v32 = vsel %vm217_vm1, %v240_v29, 0.0 }
  0x35   : > { %v244_v33 = vadd.f32 %v243_v31, %v242_v30  ;;  %v250_v34 = vrot.slane %v249_v32, 4  ;;  %v329_v31 = vld [vmem:[%s565_s23] sm:$0x3] }
  0x37   : > { %v245_v35 = vrot.slane %v244_v33, 2  ;;  %v251_v36 = vadd.f32 %v250_v34, %v249_v32 }
  0x39   : > { %v246_v37 = vadd.f32 %v245_v35, %v244_v33  ;;  %v252_v38 = vrot.slane %v251_v36, 2 }
  0x3b   : > { %v247_v39 = vrot.slane %v246_v37, 1  ;;  %v253_v40 = vadd.f32 %v252_v38, %v251_v36 }
  0x3d   : > { %v248_v41 = vadd.f32 %v247_v39, %v246_v37  ;;  %v254_v42 = vrot.slane %v253_v40, 1 }
  0x3f   : > { %v255_v43 = vadd.f32 %v254_v42, %v253_v40 }
  0x41   : > { %v258_v44 = vcombine.low %v248_v41, %v255_v43 }
  0x43   : > { %481 = vrcp.f32 %v258_v44 }
  0x4d   : > { %v482_v45 = vpop.eup %481 }
  0x4e   : > { %v261_v46 = vmul.f32 %v482_v45, %v480_v28  ;;  %v342_v28 = vsub.s32 %v339_v23, %v548_v1 }
  0x50   : > { %v262_v47 = vmul.f32 1.442695, %v261_v46  ;;  %v298_v48 = vcombine.high %v261_v46, %v261_v46  ;;  %v300_v49 = vsel %vm295_vm2, %v261_v46, 0.0 }
  0x51   : > { %v302_v52 = vsel %vm217_vm1, %v300_v49, 0.0 }
  0x52   : > { %483 = vpow2.f32 %v262_v47  ;;  %v301_v50 = vsel %vm296_vm3, %v298_v48, 0.0  ;;  %v303_v58 = vrot.slane %v302_v52, 4 }
  0x53   : > { %v309_v56 = vsel %vm217_vm1, %v301_v50, 0.0 }
  0x54   : > { %v310_v61 = vrot.slane %v309_v56, 4  ;;  %v304_v0 = vadd.f32 %v303_v58, %v302_v52 }
  0x56   : > { %v311_v5 = vadd.f32 %v310_v61, %v309_v56  ;;  %v305_v8 = vrot.slane %v304_v0, 2 }
  0x58   : > { %v312_v11 = vrot.slane %v311_v5, 2  ;;  %v306_v13 = vadd.f32 %v305_v8, %v304_v0 }
  0x5a   : > { %v313_v14 = vadd.f32 %v312_v11, %v311_v5  ;;  %v307_v15 = vrot.slane %v306_v13, 1 }
  0x5c   : > { %v484_v51 = vpop.eup %483  ;;  %v314_v16 = vrot.slane %v313_v14, 1  ;;  %v308_v19 = vadd.f32 %v307_v15, %v306_v13 }
  0x5d   : > { %v265_v53 = vcombine.high %v484_v51, %v484_v51  ;;  %v267_v54 = vsel %vm217_vm1, %v484_v51, 0.0 }
  0x5e   : > { %v268_v55 = vrot.slane %v267_v54, 4  ;;  %v315_v22 = vadd.f32 %v314_v16, %v313_v14 }
  0x5f   : > { %v274_v57 = vsel %vm217_vm1, %v265_v53, 0.0 }
  0x60   : > { %v269_v59 = vadd.f32 %v268_v55, %v267_v54  ;;  %v275_v60 = vrot.slane %v274_v57, 4 }
  0x62   : > { %v270_v62 = vrot.slane %v269_v59, 2  ;;  %v276_v63 = vadd.f32 %v275_v60, %v274_v57 }
  0x64   : > { %v271_v3 = vadd.f32 %v270_v62, %v269_v59  ;;  %v277_v4 = vrot.slane %v276_v63, 2 }
  0x66   : > { %v272_v6 = vrot.slane %v271_v3, 1  ;;  %v278_v7 = vadd.f32 %v277_v4, %v276_v63 }
  0x68   : > { %v273_v9 = vadd.f32 %v272_v6, %v271_v3  ;;  %v279_v10 = vrot.slane %v278_v7, 1 }
  0x6a   : > { %v280_v12 = vadd.f32 %v279_v10, %v278_v7  ;;  %485 = vlog2.f32 %v273_v9 }
  0x6c   : > { %487 = vlog2.f32 %v280_v12 }
  0x74   : > { %v486_v20 = vpop.eup %485 }
  0x75   : > { %v282_v21 = vmul.f32 0.6931472, %v486_v20 }
  0x76   : > { %v488_v24 = vpop.eup %487 }
  0x77   : > { %v284_v25 = vmul.f32 0.6931472, %v488_v24  ;;  %v330_v26 = vsub.f32 %v282_v21, %v308_v19 }
  0x79   : > { %v331_v27 = vsub.f32 %v284_v25, %v315_v22 }
  0x7b   : > { %v336_v29 = vcombine.low %v330_v26, %v331_v27 }
  0x7d   : > { %v343_v30 = vrot.slane %v336_v29, %v342_v28 }
  0x7f   : > { %v350_v32 = vrot.slane %v343_v30, %v342_v28 }
  0x81   : > { %v352_v33 = vadd.f32 %v350_v32, %v329_v31 }
  0x83   : > { %357 = vst.msk [vmem:[%s565_s23] sm:$0x3] %vm550_vm0, %v352_v33 }
  0x84 PF: > { %s12_s11 = sadd.s32 1, %s511_s11   ;;  %s603_s9 = smov %s507_s10 }
  0x85   : > { %p9_p5 = scmp.ge.s32.totalorder %s12_s11, 4   ;;  %s604_s10 = smov %s606_s12 }
  0x87   :  { %11 = sbr.rel (!%p9_p5) target bundleno = 2 (0x2), region = 65 }

</bundles_post_ra>
